<compile_context>
chip_gen: v6e
topology: v6e:2x2x1
jax: 0.10.0
libtpu: 0.0.40
codegen_flags: <defaults>
</compile_context>

<pallas_src>
import jax
import jax.numpy as jnp
from jax.experimental import pallas as pl
from jax.experimental.pallas import tpu as pltpu

EPS = 1e-5                                   # nn.BatchNorm1d default eps
K = 4                                        # kernel_size == stride for every deconv
_PREC = jax.lax.Precision.DEFAULT            # single bf16 MXU pass, f32 accumulate
_REF_PREC = jax.lax.Precision.HIGHEST        # reference stays full f32


def _make_decoder_kernel(hidden_meta):
    """Fused [ConvTranspose1d(k=4,s=4) -> BN(train stats) -> ReLU]*H + ConvTranspose1d.

    hidden_meta: per hidden layer l, (reps, c) with reps = K^l, c = C_l; that layer's
    pre-BN activation has shape (reps*c, M0).

    Ref order (all f32):
      refs[0]            : (C0, M0) input, channels on sublanes, (b, t0) on lanes
      per hidden layer   : (K^l*C_l, K^(l-1)*C_{l-1}) block-diag weight,
                           (1, C_l, 1) gamma, (1, C_l, 1) beta
      then               : (K^L*C_out, K^(L-1)*C_{L-1}) out weight, (K^L*C_out, 1) bias
      refs[-1]           : (K^L*C_out, M0) output (taps on sublanes, true-time order
                           restored by a single wrapper transpose)
    """

    def kernel(*refs):
        o_ref = refs[-1]
        a = refs[0][...]                                     # (K^0*C0, M0)
        idx = 1
        for (reps, c) in hidden_meta:
            w_ref, g_ref, beta_ref = refs[idx], refs[idx + 1], refs[idx + 2]
            idx += 3
            # ConvTranspose1d(k=4,s=4): ONE matmul with the block-diagonal
            # (I_{K^(l-1)} kron W_l) weight -> (K^l*C_l, M0); taps land on sublanes.
            y = jnp.dot(w_ref[...], a, precision=_PREC,
                        preferred_element_type=jnp.float32)
            m = y.shape[1]
            y3 = y.reshape(reps, c, m)                       # sublane-block view
            # BatchNorm1d (training-mode batch stats, biased var) -- one pass:
            # per-channel sum and sum-of-squares, var = E[y^2] - mean^2.
            s1 = jnp.sum(y3, axis=2, keepdims=True)          # lane reduce (XLU)
            s2 = jnp.sum(y3 * y3, axis=2, keepdims=True)
            s1 = jnp.sum(s1, axis=0, keepdims=True)          # fold tap blocks (VALU)
            s2 = jnp.sum(s2, axis=0, keepdims=True)
            inv_n = 1.0 / (reps * m)
            mean = s1 * inv_n                                # (1, C_l, 1)
            var = s2 * inv_n - mean * mean
            scale = g_ref[...] * jax.lax.rsqrt(var + EPS)    # gamma * rsqrt(var+eps), EUP
            shift = beta_ref[...] - mean * scale             # beta - mean*scale
            # Hidden deconv bias omitted: exactly cancelled by the mean subtraction.
            a = jnp.maximum(y3 * scale + shift, 0.0).reshape(reps * c, m)   # F.relu
        # Output deconv: block-diagonal matmul + (row-tiled) bias, no BN / activation.
        w_ref, bias_ref = refs[idx], refs[idx + 1]
        o_ref[...] = jnp.dot(w_ref[...], a, precision=_PREC,
                             preferred_element_type=jnp.float32) + bias_ref[...]

    return kernel


def _full_block_spec(arr):
    nd = arr.ndim
    return pl.BlockSpec(arr.shape, lambda i, _nd=nd: (0,) * _nd)


def sound_cnn_decoder(x_tbc, hidden_params, out_weight, out_bias, target_len=None):
    """Forward pass of SoundCNNDecoder.

    x_tbc        : (T, B, arch[0]) float32 (seq-first, like the PyTorch module input).
    hidden_params: list of (weight (Cin, Cout, 4), bias (Cout,), gamma (Cout,), beta (Cout,)),
                   one per hidden deconv+BN+ReLU block.  The conv bias is accepted but
                   unused (exactly cancelled by training-mode BN).
    out_weight   : (Cin_last, arch[-1], 4); out_bias: (arch[-1],).
    Returns (T*4**num_layers [clipped to target_len], B, arch[-1]).
    """
    T0, B, C0 = x_tbc.shape
    num_hidden = len(hidden_params)
    L = num_hidden + 1
    M0 = B * T0
    C_out = out_weight.shape[1]

    # permute(1,2,0) equivalent -> internal (C, B*T0) layout; columns (b, t0) stay the
    # lane axis for the whole stack.
    a0 = jnp.transpose(x_tbc, (2, 1, 0)).reshape(C0, M0).astype(jnp.float32)

    inputs = [a0]
    hidden_meta = []
    flops = 0
    reps_in = 1
    c_prev = C0
    for (w, _b, gamma, beta) in hidden_params:
        c_l = w.shape[1]
        # (Cin, Cout, K) -> (K*Cout, Cin): row (k, cout) is tap k, ready for W @ A.
        w_s = jnp.transpose(w, (2, 1, 0)).reshape(K * c_l, c_prev).astype(jnp.float32)
        # Block-diagonal I_{K^(l-1)} kron W_l: applies W_l to every existing tap block
        # in a single matmul, keeping tap digits on the sublane axis.
        w_bd = jnp.kron(jnp.eye(reps_in, dtype=jnp.float32), w_s)
        inputs.append(w_bd)
        inputs.append(gamma.reshape(1, c_l, 1).astype(jnp.float32))
        inputs.append(beta.reshape(1, c_l, 1).astype(jnp.float32))
        flops += 2 * w_bd.shape[0] * w_bd.shape[1] * M0
        reps_in *= K
        hidden_meta.append((reps_in, c_l))
        c_prev = c_l
    w_s = jnp.transpose(out_weight, (2, 1, 0)).reshape(K * C_out, c_prev).astype(jnp.float32)
    w_bd = jnp.kron(jnp.eye(reps_in, dtype=jnp.float32), w_s)
    inputs.append(w_bd)
    reps_out = reps_in * K                                    # = K**L
    R_out = reps_out * C_out
    inputs.append(jnp.tile(out_bias.astype(jnp.float32), reps_out).reshape(R_out, 1))
    flops += 2 * w_bd.shape[0] * w_bd.shape[1] * M0

    transcendentals = sum(c for (_r, c) in hidden_meta)       # one rsqrt per BN channel
    bytes_accessed = sum(int(a.size) for a in inputs) * 4 + R_out * M0 * 4

    out_flat = pl.pallas_call(
        _make_decoder_kernel(hidden_meta),
        out_shape=jax.ShapeDtypeStruct((R_out, M0), jnp.float32),
        grid=(1,),
        in_specs=[_full_block_spec(a) for a in inputs],
        out_specs=pl.BlockSpec((R_out, M0), lambda i: (0, 0)),
        compiler_params=pltpu.CompilerParams(
            dimension_semantics=("arbitrary",),
            vmem_limit_bytes=32 * 1024 * 1024,
        ),
        cost_estimate=pl.CostEstimate(
            flops=flops,
            transcendentals=transcendentals,
            bytes_accessed=bytes_accessed,
        ),
    )(*inputs)

    # Rows are (k_1, ..., k_L, c) with true time t = t0*K^L + sum_j k_j * K^(L-j);
    # columns are (b, t0).  One small transpose to the module's (T, B, C) layout.
    out = out_flat.reshape((K,) * L + (C_out, B, T0))
    perm = (L + 2,) + tuple(range(L)) + (L + 1, L)
    out = jnp.transpose(out, perm).reshape(T0 * (K ** L), B, C_out)
    if target_len is not None:                                # normalize_seq_len(target_len=)
        out = out[:target_len]
    return out


def _reference_decoder(x_tbc, hidden_params, out_weight, out_bias, target_len=None):
    """Pure-jnp reference following the PyTorch module literally (NCW layout, full f32)."""
    r = jnp.transpose(x_tbc, (1, 2, 0)).astype(jnp.float32)       # (B, C, T)

    def deconv(r, w, b):
        Bn, _Ci, T = r.shape
        Co = w.shape[1]
        y = jnp.einsum('bit,iok->botk', r, w, precision=_REF_PREC)  # out[b,o,4t+k]
        return y.reshape(Bn, Co, T * K) + b[None, :, None]

    for (w, b, gamma, beta) in hidden_params:
        y = deconv(r, w, b)
        mean = jnp.mean(y, axis=(0, 2), keepdims=True)
        var = jnp.mean(jnp.square(y - mean), axis=(0, 2), keepdims=True)
        y = (y - mean) * jax.lax.rsqrt(var + EPS)
        y = y * gamma[None, :, None] + beta[None, :, None]
        r = jnp.maximum(y, 0.0)
    r = deconv(r, out_weight, out_bias)
    if target_len is not None:
        r = r[:, :, :target_len]
    return jnp.transpose(r, (2, 0, 1))


if __name__ == "__main__":
    key = jax.random.PRNGKey(0)
    arch = [16, 8, 4]          # latent 16 -> hidden 8 -> 4 output channels
    T0, B = 4, 2               # input (T=4, B=2, C=16); T_out = 4 * 4^2 = 64
    target_len = 60            # exercise normalize_seq_len(target_len=...)

    keys = jax.random.split(key, 16)
    x = jax.random.normal(keys[0], (T0, B, arch[0]), dtype=jnp.float32)

    hidden_params = []
    cin = arch[0]
    ki = 1
    for cout in arch[1:-1]:
        bound = 1.0 / (cin * K) ** 0.5
        w = jax.random.uniform(keys[ki], (cin, cout, K), minval=-bound, maxval=bound,
                               dtype=jnp.float32); ki += 1
        b = jax.random.uniform(keys[ki], (cout,), minval=-bound, maxval=bound,
                               dtype=jnp.float32); ki += 1   # cancelled by train-mode BN
        g = 1.0 + 0.1 * jax.random.normal(keys[ki], (cout,), dtype=jnp.float32); ki += 1
        be = 0.1 * jax.random.normal(keys[ki], (cout,), dtype=jnp.float32); ki += 1
        hidden_params.append((w, b, g, be))
        cin = cout
    bound = 1.0 / (cin * K) ** 0.5
    out_w = jax.random.uniform(keys[ki], (cin, arch[-1], K), minval=-bound, maxval=bound,
                               dtype=jnp.float32); ki += 1
    out_b = jax.random.uniform(keys[ki], (arch[-1],), minval=-bound, maxval=bound,
                               dtype=jnp.float32)

    out = sound_cnn_decoder(x, hidden_params, out_w, out_b, target_len=target_len)
    out = jax.block_until_ready(out)
    assert out.shape == (target_len, B, arch[-1]), out.shape

    ref = _reference_decoder(x, hidden_params, out_w, out_b, target_len=target_len)
    # Tolerance reflects Precision.DEFAULT (single-pass bf16 MXU, f32 accumulate) vs the
    # full-f32 reference; contraction dims are <= 64, typical deviation is a few 1e-3.
    err = float(jnp.max(jnp.abs(out - ref)))
    assert jnp.allclose(out, ref, rtol=3e-2, atol=3e-2), err

    print("KERNEL_OK")
</pallas_src>

<mosaic_0001>
module attributes {stable_mosaic.version = 11 : i64} {
  func.func @kernel(%arg0: i32, %arg1: memref<16x8xf32, #tpu.memory_space<vmem>>, %arg2: memref<32x16xf32, #tpu.memory_space<vmem>>, %arg3: memref<1x8x1xf32, #tpu.memory_space<vmem>>, %arg4: memref<1x8x1xf32, #tpu.memory_space<vmem>>, %arg5: memref<64x32xf32, #tpu.memory_space<vmem>>, %arg6: memref<64x1xf32, #tpu.memory_space<vmem>>, %arg7: memref<64x8xf32, #tpu.memory_space<vmem>>) attributes {dimension_semantics = [#tpu.dimension_semantics<arbitrary>], iteration_bounds = array<i64: 1>, scalar_prefetch = 0 : i64, scratch_operands = 0 : i64, tpu.core_type = #tpu.core_type<tc>, window_params = [{pipeline_mode = #tpu.pipeline_mode<synchronous>, transform_indices = @transform_0, window_bounds = array<i64: 16, 8>}, {pipeline_mode = #tpu.pipeline_mode<synchronous>, transform_indices = @transform_1, window_bounds = array<i64: 32, 16>}, {pipeline_mode = #tpu.pipeline_mode<synchronous>, transform_indices = @transform_2, window_bounds = array<i64: 1, 8, 1>}, {pipeline_mode = #tpu.pipeline_mode<synchronous>, transform_indices = @transform_3, window_bounds = array<i64: 1, 8, 1>}, {pipeline_mode = #tpu.pipeline_mode<synchronous>, transform_indices = @transform_4, window_bounds = array<i64: 64, 32>}, {pipeline_mode = #tpu.pipeline_mode<synchronous>, transform_indices = @transform_5, window_bounds = array<i64: 64, 1>}, {pipeline_mode = #tpu.pipeline_mode<synchronous>, transform_indices = @transform_6, window_bounds = array<i64: 64, 8>}]} {
    %c0 = arith.constant 0 : index
    %c0_0 = arith.constant 0 : index
    %0 = vector.load %arg1[%c0, %c0_0] : memref<16x8xf32, #tpu.memory_space<vmem>>, vector<16x8xf32>
    %c0_1 = arith.constant 0 : index
    %c0_2 = arith.constant 0 : index
    %1 = vector.load %arg2[%c0_1, %c0_2] : memref<32x16xf32, #tpu.memory_space<vmem>>, vector<32x16xf32>
    %cst = arith.constant dense<0.000000e+00> : vector<32x8xf32>
    %2 = tpu.matmul %1, %0, %cst {dimension_numbers = #tpu.dot_dimension_numbers<[1], [0], [0], [1], [0, 0, 1, 1], [], []>} : vector<32x16xf32>, vector<16x8xf32>, vector<32x8xf32> -> vector<32x8xf32>
    %3 = vector.shape_cast %2 : vector<32x8xf32> to vector<4x8x8xf32>
    %cst_3 = arith.constant dense<0.000000e+00> : vector<4x8xf32>
    %4 = vector.multi_reduction <add>, %3, %cst_3 [2] : vector<4x8x8xf32> to vector<4x8xf32>
    %5 = vector.shape_cast %4 : vector<4x8xf32> to vector<4x8x1xf32>
    %6 = arith.mulf %3, %3 : vector<4x8x8xf32>
    %cst_4 = arith.constant dense<0.000000e+00> : vector<4x8xf32>
    %7 = vector.multi_reduction <add>, %6, %cst_4 [2] : vector<4x8x8xf32> to vector<4x8xf32>
    %8 = vector.shape_cast %7 : vector<4x8xf32> to vector<4x8x1xf32>
    %cst_5 = arith.constant dense<0.000000e+00> : vector<8x1xf32>
    %9 = vector.multi_reduction <add>, %5, %cst_5 [0] : vector<4x8x1xf32> to vector<8x1xf32>
    %10 = vector.shape_cast %9 : vector<8x1xf32> to vector<1x8x1xf32>
    %cst_6 = arith.constant dense<0.000000e+00> : vector<8x1xf32>
    %11 = vector.multi_reduction <add>, %8, %cst_6 [0] : vector<4x8x1xf32> to vector<8x1xf32>
    %12 = vector.shape_cast %11 : vector<8x1xf32> to vector<1x8x1xf32>
    %cst_7 = arith.constant 3.125000e-02 : f32
    %13 = vector.broadcast %cst_7 : f32 to vector<1x8x1xf32>
    %14 = arith.mulf %10, %13 : vector<1x8x1xf32>
    %cst_8 = arith.constant 3.125000e-02 : f32
    %15 = vector.broadcast %cst_8 : f32 to vector<1x8x1xf32>
    %16 = arith.mulf %12, %15 : vector<1x8x1xf32>
    %17 = arith.mulf %14, %14 : vector<1x8x1xf32>
    %18 = arith.subf %16, %17 : vector<1x8x1xf32>
    %c0_9 = arith.constant 0 : index
    %c0_10 = arith.constant 0 : index
    %c0_11 = arith.constant 0 : index
    %19 = vector.load %arg3[%c0_9, %c0_10, %c0_11] : memref<1x8x1xf32, #tpu.memory_space<vmem>>, vector<1x8x1xf32>
    %cst_12 = arith.constant 9.99999974E-6 : f32
    %20 = vector.broadcast %cst_12 : f32 to vector<1x8x1xf32>
    %21 = arith.addf %18, %20 : vector<1x8x1xf32>
    %22 = math.rsqrt %21 : vector<1x8x1xf32>
    %23 = arith.mulf %19, %22 : vector<1x8x1xf32>
    %c0_13 = arith.constant 0 : index
    %c0_14 = arith.constant 0 : index
    %c0_15 = arith.constant 0 : index
    %24 = vector.load %arg4[%c0_13, %c0_14, %c0_15] : memref<1x8x1xf32, #tpu.memory_space<vmem>>, vector<1x8x1xf32>
    %25 = arith.mulf %14, %23 : vector<1x8x1xf32>
    %26 = arith.subf %24, %25 : vector<1x8x1xf32>
    %27 = vector.broadcast %23 : vector<1x8x1xf32> to vector<4x8x8xf32>
    %28 = arith.mulf %3, %27 : vector<4x8x8xf32>
    %29 = vector.broadcast %26 : vector<1x8x1xf32> to vector<4x8x8xf32>
    %30 = arith.addf %28, %29 : vector<4x8x8xf32>
    %cst_16 = arith.constant 0.000000e+00 : f32
    %31 = vector.broadcast %cst_16 : f32 to vector<4x8x8xf32>
    %32 = arith.maximumf %30, %31 : vector<4x8x8xf32>
    %33 = vector.shape_cast %32 : vector<4x8x8xf32> to vector<32x8xf32>
    %c0_17 = arith.constant 0 : index
    %c0_18 = arith.constant 0 : index
    %34 = vector.load %arg5[%c0_17, %c0_18] : memref<64x32xf32, #tpu.memory_space<vmem>>, vector<64x32xf32>
    %cst_19 = arith.constant dense<0.000000e+00> : vector<64x8xf32>
    %35 = tpu.matmul %34, %33, %cst_19 {dimension_numbers = #tpu.dot_dimension_numbers<[1], [0], [0], [1], [0, 0, 1, 1], [], []>} : vector<64x32xf32>, vector<32x8xf32>, vector<64x8xf32> -> vector<64x8xf32>
    %c0_20 = arith.constant 0 : index
    %c0_21 = arith.constant 0 : index
    %36 = vector.load %arg6[%c0_20, %c0_21] : memref<64x1xf32, #tpu.memory_space<vmem>>, vector<64x1xf32>
    %37 = vector.broadcast %36 : vector<64x1xf32> to vector<64x8xf32>
    %38 = arith.addf %35, %37 : vector<64x8xf32>
    %c0_22 = arith.constant 0 : index
    %c0_23 = arith.constant 0 : index
    %39 = vector.load %arg7[%c0_22, %c0_23] : memref<64x8xf32, #tpu.memory_space<vmem>>, vector<64x8xf32>
    tpu.vector_store %arg7[%c0_22, %c0_23], %38 {strides = array<i32>} : memref<64x8xf32, #tpu.memory_space<vmem>>, vector<64x8xf32>,
    return
  }
  func.func @transform_0(%arg0: i32) -> (i32, i32) {
    %c0_i32 = arith.constant 0 : i32
    %c0_i32_0 = arith.constant 0 : i32
    %c0_i32_1 = arith.constant 0 : i32
    return %c0_i32, %c0_i32_0 : i32, i32
  }
  func.func @transform_1(%arg0: i32) -> (i32, i32) {
    %c0_i32 = arith.constant 0 : i32
    %c0_i32_0 = arith.constant 0 : i32
    %c0_i32_1 = arith.constant 0 : i32
    return %c0_i32, %c0_i32_0 : i32, i32
  }
  func.func @transform_2(%arg0: i32) -> (i32, i32, i32) {
    %c0_i32 = arith.constant 0 : i32
    %c0_i32_0 = arith.constant 0 : i32
    %c0_i32_1 = arith.constant 0 : i32
    %c0_i32_2 = arith.constant 0 : i32
    return %c0_i32, %c0_i32_0, %c0_i32_1 : i32, i32, i32
  }
  func.func @transform_3(%arg0: i32) -> (i32, i32, i32) {
    %c0_i32 = arith.constant 0 : i32
    %c0_i32_0 = arith.constant 0 : i32
    %c0_i32_1 = arith.constant 0 : i32
    %c0_i32_2 = arith.constant 0 : i32
    return %c0_i32, %c0_i32_0, %c0_i32_1 : i32, i32, i32
  }
  func.func @transform_4(%arg0: i32) -> (i32, i32) {
    %c0_i32 = arith.constant 0 : i32
    %c0_i32_0 = arith.constant 0 : i32
    %c0_i32_1 = arith.constant 0 : i32
    return %c0_i32, %c0_i32_0 : i32, i32
  }
  func.func @transform_5(%arg0: i32) -> (i32, i32) {
    %c0_i32 = arith.constant 0 : i32
    %c0_i32_0 = arith.constant 0 : i32
    %c0_i32_1 = arith.constant 0 : i32
    return %c0_i32, %c0_i32_0 : i32, i32
  }
  func.func @transform_6(%arg0: i32) -> (i32, i32) {
    %c0_i32 = arith.constant 0 : i32
    %c0_i32_0 = arith.constant 0 : i32
    %c0_i32_1 = arith.constant 0 : i32
    return %c0_i32, %c0_i32_0 : i32, i32
  }
}

</mosaic_0001>

<bundles_post_ra>
// kernel: tpu_custom_call.1
= control target key start
LH: loop header
LB: loop body
LE: loop exit
PB: predicated region body
PF: predicated region fallthrough
CT: control target
= control target key end

     0   :  { %vm29_vm0 = vcmask 130048   ;;  %vm127_vm1 = vcmask 64512   ;;  %v466_v22 = vmov 0   ;;  %vm251_vm2 = vcmask 261120   ;;  %s646_s0 = inlined_call_operand.vmem [shape: f32[16,8], index: 0, kind: input, shape index: {}]   ;;  %s647_s1 = inlined_call_operand.vmem [shape: f32[32,16], index: 1, kind: input, shape index: {}]   ;;  %s648_s2 = inlined_call_operand.vmem [shape: f32[1,8,1], index: 2, kind: input, shape index: {}]   ;;  %s649_s3 = inlined_call_operand.vmem [shape: f32[1,8,1], index: 3, kind: input, shape index: {}]   ;;  %s650_s5 = inlined_call_operand.vmem [shape: f32[64,1], index: 5, kind: input, shape index: {}]   ;;  %s651_s4 = inlined_call_operand.vmem [shape: f32[64,32], index: 4, kind: input, shape index: {}]   ;;  %s652_s6 = inlined_call_operand.vmem [shape: f32[64,8], index: 6, kind: output, shape index: {}]  }
   0x1   :  { %v24_v0 = vld [vmem:[%s646_s0 + $0x8] sm:$0xff]  ;;  %v23_v1 = vld [vmem:[%s646_s0] sm:$0xff]  ;;  %v27_v4 = vld [vmem:[%s647_s1 + $0x10] sm:$0xff]  ;;  %462 = vset.pattern.permute.xlu0 %v466_v22  ;;  %463 = vset.pattern.permute.xlu1 %v466_v22 }
   0x2   :  { %v25_v2 = vld [vmem:[%s647_s1] sm:$0xff]  ;;  %423 = vmatprep.subr.mxu0 %v24_v0  ;;  %v26_v3 = vld [vmem:[%s647_s1 + $0x8] sm:$0xff]  ;;  %v28_v5 = vld [vmem:[%s647_s1 + $0x18] sm:$0xff] }
   0x3   :  { %427 = vmatprep.mubr.msk.f32.mxu0 %vm29_vm0, %v25_v2  ;;  %424 = vmatpush3.msra.mxu0 %v24_v0  ;;  %v166_v42 = vld [vmem:[%s648_s2] sm:$0xff]  ;;  %v210_v47 = vld [vmem:[%s650_s5 + $0x38] sm:$0xff]  ;;  %v204_v50 = vld [vmem:[%s650_s5 + $0x8] sm:$0xff] }
   0x4   :  { %425 = vmatprep.subr.mxu0 %v23_v1  ;;  %v170_v45 = vld [vmem:[%s649_s3] sm:$0xff]  ;;  %v197_v52 = vld [vmem:[%s651_s4 + $0x10] sm:$0xff]  ;;  %v206_v54 = vld [vmem:[%s650_s5 + $0x18] sm:$0xff] }
   0x5   :  { %426 = vmatpush3.msra.mxu0 %v23_v1  ;;  %v203_v49 = vld [vmem:[%s650_s5] sm:$0xff]  ;;  %444 = vmatprep.mubr.msk.f32.mxu1 %vm251_vm2, %v197_v52  ;;  %v205_v53 = vld [vmem:[%s650_s5 + $0x10] sm:$0xff]  ;;  %v208_v56 = vld [vmem:[%s650_s5 + $0x28] sm:$0xff] }
   0x6   :  { %428 = vmatmul.mubr.msk.f32.vlgmr.msra.gmra.mxu0 %vm29_vm0, %v26_v3  ;;  %v195_v51 = vld [vmem:[%s651_s4] sm:$0xff]  ;;  %v209_v57 = vld [vmem:[%s650_s5 + $0x30] sm:$0xff] }
   0x7   :  { %430 = vmatprep.mubr.msk.f32.mxu0 %vm29_vm0, %v27_v4  ;;  %v207_v55 = vld [vmem:[%s650_s5 + $0x20] sm:$0xff] }
   0xa   :  { %431 = vmatmul.mubr.msk.f32.gmra.mxu0 %vm29_vm0, %v28_v5 }
   0xb   :  { %441 = vmatprep.mubr.msk.f32.mxu0 %vm251_vm2, %v195_v51 }
  0xc6   :  { %v520_v6 = vpop.f32.mrf.mxu0 }
  0xc7   :  { %v131_v7 = vsel %vm127_vm1, %v520_v6, 0.0  ;;  %v141_v13 = vmul.f32 %v520_v6, %v520_v6 }
  0xc8   :  { %132 = vadd.xlane.f32.xlu0 %v131_v7  ;;  %v524_v8 = vpop.f32.mrf.mxu0 }
  0xc9   :  { %v140_v9 = vmul.f32 %v524_v8, %v524_v8  ;;  %v128_v12 = vsel %vm127_vm1, %v524_v8, 0.0  ;;  %v147_v16 = vsel %vm127_vm1, %v141_v13, 0.0  ;;  %v202_v13 = vld [vmem:[%s651_s4 + $0x38] sm:$0xff] }
  0xca   :  { %v528_v10 = vpop.f32.mrf.mxu0 }
  0xcb   :  { %v144_v11 = vsel %vm127_vm1, %v140_v9, 0.0  ;;  %v137_v15 = vsel %vm127_vm1, %v528_v10, 0.0  ;;  %v143_v20 = vmul.f32 %v528_v10, %v528_v10 }
  0xcc   :  { %145 = vadd.xlane.f32.xlu1 %v144_v11  ;;  %129 = vadd.xlane.f32.xlu0 %v128_v12  ;;  %v535_v14 = vpop.f32.mrf.mxu0  ;;  %v200_v11 = vld [vmem:[%s651_s4 + $0x28] sm:$0xff]  ;;  %v201_v12 = vld [vmem:[%s651_s4 + $0x30] sm:$0xff] }
  0xcd   :  { %v142_v17 = vmul.f32 %v535_v14, %v535_v14  ;;  %v134_v19 = vsel %vm127_vm1, %v535_v14, 0.0  ;;  %v153_v21 = vsel %vm127_vm1, %v143_v20, 0.0 }
  0xcf   :  { %v150_v18 = vsel %vm127_vm1, %v142_v17, 0.0 }
  0xd0   :  { %148 = vadd.xlane.f32.xlu0 %v147_v16  ;;  %138 = vadd.xlane.f32.xlu1 %v137_v15 }
  0xd4   :  { %151 = vadd.xlane.f32.xlu0 %v150_v18  ;;  %135 = vadd.xlane.f32.xlu1 %v134_v19 }
  0xd8   :  { %154 = vadd.xlane.f32.xlu1 %v153_v21 }
 0x151   :  { %v133_v23 = vpop.xlane.xlu0 %132 }
 0x155   :  { %v146_v24 = vpop.xlane.xlu1 %145  ;;  %v130_v25 = vpop.xlane.xlu0 %129 }
 0x156   :  { %v156_v28 = vadd.f32 %v133_v23, %v130_v25 }
 0x159   :  { %v149_v26 = vpop.xlane.xlu0 %148  ;;  %v139_v27 = vpop.xlane.xlu1 %138 }
 0x15a   :  { %v159_v31 = vadd.f32 %v149_v26, %v146_v24 }
 0x15d   :  { %v152_v29 = vpop.xlane.xlu0 %151  ;;  %v136_v30 = vpop.xlane.xlu1 %135 }
 0x15e   :  { %v157_v32 = vadd.f32 %v156_v28, %v136_v30  ;;  %v160_v33 = vadd.f32 %v159_v31, %v152_v29 }
 0x160   :  { %v158_v34 = vadd.f32 %v157_v32, %v139_v27 }
 0x161   :  { %v155_v35 = vpop.xlane.xlu1 %154 }
 0x162   :  { %v162_v36 = vmul.f32 0.03125, %v158_v34  ;;  %v161_v37 = vadd.f32 %v160_v33, %v155_v35 }
 0x164   :  { %v164_v38 = vmul.f32 %v162_v36, %v162_v36  ;;  %v163_v39 = vmul.f32 0.03125, %v161_v37 }
 0x166   :  { %v165_v40 = vsub.f32 %v163_v39, %v164_v38 }
 0x168   :  { %v167_v41 = vadd.f32 1e-05, %v165_v40 }
 0x16a   :  { %464 = vrsqrt.f32 %v167_v41 }
 0x177   :  { %v465_v43 = vpop.eup %464 }
 0x178   :  { %v169_v44 = vmul.f32 %v465_v43, %v166_v42 }
 0x17a   :  { %175 = vperm.xlu0 %462, %v169_v44   ;;  %v171_v46 = vmul.f32 %v169_v44, %v162_v36 }
 0x17c   :  { %v172_v48 = vsub.f32 %v170_v45, %v171_v46 }
 0x17e   :  { %248 = vperm.xlu0 %462, %v210_v47   ;;  %184 = vperm.xlu1 %463, %v172_v48  }
 0x182   :  { %213 = vperm.xlu1 %463, %v203_v49  }
 0x186   :  { %218 = vperm.xlu1 %463, %v204_v50  }
 0x18a   :  { %223 = vperm.xlu1 %463, %v205_v53  }
 0x18e   :  { %228 = vperm.xlu1 %463, %v206_v54  }
 0x192   :  { %233 = vperm.xlu1 %463, %v207_v55  }
 0x196   :  { %238 = vperm.xlu1 %463, %v208_v56  }
 0x19a   :  { %243 = vperm.xlu1 %463, %v209_v57  }
 0x1f5   :  { %v176_v58 = vpop.permute.xlu0 %175 }
 0x1f6   :  { %v180_v59 = vmul.f32 %v176_v58, %v535_v14  ;;  %v181_v60 = vmul.f32 %v528_v10, %v176_v58  ;;  %v179_v62 = vmul.f32 %v520_v6, %v176_v58  ;;  %v178_v1 = vmul.f32 %v176_v58, %v524_v8  ;;  %v196_v6 = vld [vmem:[%s651_s4 + $0x8] sm:$0xff]  ;;  %v198_v8 = vld [vmem:[%s651_s4 + $0x18] sm:$0xff]  ;;  %v199_v10 = vld [vmem:[%s651_s4 + $0x20] sm:$0xff] }
 0x1f9   :  { %v185_v61 = vpop.permute.xlu1 %184  ;;  %v249_v32 = vpop.permute.xlu0 %248 }
 0x1fa   :  { %v189_v63 = vadd.f32 %v185_v61, %v180_v59  ;;  %v190_v0 = vadd.f32 %v185_v61, %v181_v60  ;;  %v188_v2 = vadd.f32 %v185_v61, %v179_v62  ;;  %v187_v4 = vadd.f32 %v185_v61, %v178_v1 }
 0x1fc   :  { %v194_v3 = vmax.f32 %v190_v0, 0.0  ;;  %v193_v5 = vmax.f32 %v189_v63, 0.0  ;;  %v192_v7 = vmax.f32 %v188_v2, 0.0  ;;  %v191_v9 = vmax.f32 %v187_v4, 0.0 }
 0x1fd   :  { %v214_v14 = vpop.permute.xlu1 %213 }
 0x1fe   :  { %433 = vmatprep.subr.mxu0 %v194_v3  ;;  %453 = vmatprep.subr.mxu1 %v194_v3 }
 0x1ff   :  { %434 = vmatpush3.msra.mxu0 %v194_v3  ;;  %457 = vmatpush3.msra.mxu1 %v194_v3 }
 0x200   :  { %435 = vmatprep.subr.mxu0 %v193_v5  ;;  %454 = vmatprep.subr.mxu1 %v193_v5 }
 0x201   :  { %436 = vmatpush3.msra.mxu0 %v193_v5  ;;  %458 = vmatpush3.msra.mxu1 %v193_v5  ;;  %v219_v15 = vpop.permute.xlu1 %218 }
 0x202   :  { %437 = vmatprep.subr.mxu0 %v192_v7  ;;  %455 = vmatprep.subr.mxu1 %v192_v7 }
 0x203   :  { %438 = vmatpush3.msra.mxu0 %v192_v7  ;;  %459 = vmatpush3.msra.mxu1 %v192_v7 }
 0x204   :  { %439 = vmatprep.subr.mxu0 %v191_v9  ;;  %456 = vmatprep.subr.mxu1 %v191_v9 }
 0x205   :  { %440 = vmatpush3.msra.mxu0 %v191_v9  ;;  %460 = vmatpush3.msra.mxu1 %v191_v9  ;;  %v224_v16 = vpop.permute.xlu1 %223 }
 0x206   :  { %442 = vmatmul.mubr.msk.f32.vlgmr.msra.gmra.mxu0 %vm251_vm2, %v196_v6  ;;  %445 = vmatmul.mubr.msk.f32.vlgmr.msra.gmra.mxu1 %vm251_vm2, %v198_v8 }
 0x207   :  { %447 = vmatprep.mubr.msk.f32.mxu1 %vm251_vm2, %v199_v10 }
 0x209   :  { %v229_v17 = vpop.permute.xlu1 %228 }
 0x20a   :  { %448 = vmatmul.mubr.msk.f32.gmra.mxu1 %vm251_vm2, %v200_v11 }
 0x20b   :  { %450 = vmatprep.mubr.msk.f32.mxu1 %vm251_vm2, %v201_v12 }
 0x20d   :  { %v234_v18 = vpop.permute.xlu1 %233 }
 0x20e   :  { %451 = vmatmul.mubr.msk.f32.gmra.mxu1 %vm251_vm2, %v202_v13 }
 0x211   :  { %v239_v27 = vpop.permute.xlu1 %238 }
 0x215   :  { %v244_v35 = vpop.permute.xlu1 %243 }
 0x2c6   :  { %v443_v19 = vpop.f32.mrf.mxu0  ;;  %v446_v20 = vpop.f32.mrf.mxu1 }
 0x2c7   :  { %v348_v21 = vadd.f32 %v443_v19, %v219_v15  ;;  %v358_v22 = vadd.f32 %v446_v20, %v229_v17 }
 0x2c8   :  { %v342_v23 = vpop.f32.mrf.mxu0  ;;  %v352_v24 = vpop.f32.mrf.mxu1 }
 0x2c9   :  { %382 = vst.msk [vmem:[%s652_s6 + $0x8] sm:$0xff] %vm127_vm1, %v348_v21  ;;  %384 = vst.msk [vmem:[%s652_s6 + $0x18] sm:$0xff] %vm127_vm1, %v358_v22  ;;  %v343_v25 = vadd.f32 %v342_v23, %v214_v14  ;;  %v353_v26 = vadd.f32 %v352_v24, %v224_v16 }
 0x2ca   :  { %v449_v28 = vpop.f32.mrf.mxu1 }
 0x2cb   :  { %381 = vst.msk [vmem:[%s652_s6] sm:$0xff] %vm127_vm1, %v343_v25  ;;  %383 = vst.msk [vmem:[%s652_s6 + $0x10] sm:$0xff] %vm127_vm1, %v353_v26  ;;  %v368_v29 = vadd.f32 %v449_v28, %v239_v27 }
 0x2cc   :  { %v362_v30 = vpop.f32.mrf.mxu1 }
 0x2cd   :  { %386 = vst.msk [vmem:[%s652_s6 + $0x28] sm:$0xff] %vm127_vm1, %v368_v29  ;;  %v363_v31 = vadd.f32 %v362_v30, %v234_v18 }
 0x2ce   :  { %v452_v33 = vpop.f32.mrf.mxu1 }
 0x2cf   :  { %385 = vst.msk [vmem:[%s652_s6 + $0x20] sm:$0xff] %vm127_vm1, %v363_v31  ;;  %v378_v34 = vadd.f32 %v452_v33, %v249_v32 }
 0x2d0   :  { %v372_v36 = vpop.f32.mrf.mxu1 }
 0x2d1   :  { %388 = vst.msk [vmem:[%s652_s6 + $0x38] sm:$0xff] %vm127_vm1, %v378_v34  ;;  %v373_v37 = vadd.f32 %v372_v36, %v244_v35 }
 0x2d3   :  { %387 = vst.msk [vmem:[%s652_s6 + $0x30] sm:$0xff] %vm127_vm1, %v373_v37 }

</bundles_post_ra>
